<compile_context>
chip_gen: v7x
topology: tpu7x:2x2x1
jax: 0.10.0
libtpu: 0.0.40
codegen_flags: <defaults>
</compile_context>

<pallas_src>
import functools

import jax
import jax.numpy as jnp
from jax.experimental import pallas as pl
from jax.experimental.pallas import tpu as pltpu


def _band_weights(w, W):
    """Expand HWIO conv weights into per-kernel-row block-banded matmul weights.

    Built over the UNPADDED width (zero-pad columns handled implicitly by the
    band's zero entries).

    w : (3, 3, C_in, C_out)
    returns (3, W*C_in, W*C_out) with
      band[dy, q*C_in + ci, j*C_out + co] = w[dy, q - j + 1, ci, co]
        for 0 <= q - j + 1 < 3, else 0.
    """
    kh, kw, c_in, c_out = w.shape
    q = jnp.arange(W)[:, None, None]     # input column
    j = jnp.arange(W)[None, :, None]     # output column
    d = jnp.arange(kw)[None, None, :]    # kernel column
    sel = (q == j + d - (kw // 2)).astype(w.dtype)          # (W, W, 3)
    band = jnp.einsum("qjd,ydck->yqcjk", sel, w)            # (3, W, C_in, W, C_out)
    return band.reshape(kh, W * c_in, W * c_out)


def _lane_channel_sum(v, W, C_out):
    """Per-channel sum of a lane-interleaved row vector, broadcast back to lanes.

    v : (1, W*C_out) with lane l = w*C_out + c.
    Returns (1, W*C_out) where every lane of channel c holds sum_w v[w, c].
    Uses XLU lane rolls (no MXU, no relayout).
    """
    if (W & (W - 1)) == 0:            # power-of-two width: log2(W) roll tree
        shift = (W // 2) * C_out
        while shift >= C_out:
            v = v + pltpu.roll(v, shift, axis=1)
            shift //= 2
        return v
    # Generic fallback: W-1 rolls of stride C_out.
    out = v
    for k in range(1, W):
        out = out + pltpu.roll(v, k * C_out, axis=1)
    return out


def _conv_block_kernel(x_ref, b1_ref, b2_ref, o_ref, x1p_ref, x2p_ref, *,
                       H, W, C_in, C_out, eps, neg_slope):
    """One batch element (everything stays in VMEM).

    x_ref  : (1, H, W*C_in)          input rows, width*channels on lanes
    b1_ref : (3, W*C_in,  W*C_out)   banded conv1 weights (one per kernel row)
    b2_ref : (3, W*C_out, W*C_out)   banded conv2 weights
    o_ref  : (1, H, W*C_out)         output rows (lane-dense: W*C_out = 128 here)
    x1p_ref: (H+2, W*C_in)   VMEM    row-padded stage-1 input
    x2p_ref: (H+2, W*C_out)  VMEM    row-padded stage-2 input
    """
    wci = W * C_in
    wco = W * C_out
    inv_hw = jnp.float32(1.0 / (H * W))

    def conv_in_lrelu(xp_ref, band_ref):
        # 3x3 conv as 3 row-shifted matmuls against banded weights (MXU).
        acc = jnp.zeros((H, wco), dtype=jnp.float32)
        for dy in range(3):
            acc = acc + jnp.dot(xp_ref[pl.ds(dy, H), :], band_ref[dy],
                                preferred_element_type=jnp.float32)
        # InstanceNorm2d (affine=False, biased variance, eps) over all H*W
        # positions, per channel.  Channel stats via sublane sum + XLU
        # roll-tree; result is already broadcast across lanes.
        mean = _lane_channel_sum(
            jnp.sum(acc, axis=0, keepdims=True), W, C_out) * inv_hw
        diff = acc - mean
        var = _lane_channel_sum(
            jnp.sum(diff * diff, axis=0, keepdims=True), W, C_out) * inv_hw
        y = diff * jax.lax.rsqrt(var + eps)
        # LeakyReLU(negative_slope)
        return jnp.where(y >= 0, y, neg_slope * y)

    # Zero ONLY the two halo rows of each scratch (interior rows are fully
    # overwritten each step).  Re-done every step -> no reliance on scratch
    # persistence across a megacore-sharded grid.
    zci = jnp.zeros((1, wci), jnp.float32)
    zco = jnp.zeros((1, wco), jnp.float32)
    x1p_ref[pl.ds(0, 1), :] = zci
    x1p_ref[pl.ds(H + 1, 1), :] = zci
    x2p_ref[pl.ds(0, 1), :] = zco
    x2p_ref[pl.ds(H + 1, 1), :] = zco

    # ---- stage 1: Conv(C_in -> C_out) + InstanceNorm + LeakyReLU ----
    x1p_ref[pl.ds(1, H), :] = x_ref[0]          # full-width aligned store
    y1 = conv_in_lrelu(x1p_ref, b1_ref)
    # TODO(synk): Dropout2d(drop_prob) is identity here (eval-mode semantics).

    # ---- stage 2: Conv(C_out -> C_out) + InstanceNorm + LeakyReLU ----
    x2p_ref[pl.ds(1, H), :] = y1                # full-vreg aligned store
    y2 = conv_in_lrelu(x2p_ref, b2_ref)

    o_ref[0] = y2.astype(o_ref.dtype)


def conv_block(image_nchw, w1, w2, drop_prob=0.0, *, interpret=False):
    """ConvBlock.forward.

    image_nchw : (N, in_chans, H, W)                PyTorch NCHW layout
    w1         : (3, 3, in_chans, out_chans)        HWIO conv weights
    w2         : (3, 3, out_chans, out_chans)
    returns    : (N, out_chans, H, W)
    """
    del drop_prob  # Dropout2d is identity in eval mode (see TODO in kernel).
    N, C_in, H, W = image_nchw.shape
    C_out = w1.shape[-1]
    wci = W * C_in
    wco = W * C_out

    # NCHW -> NHWC -> (N, H, W*C): channels interleaved on the lane axis.
    # (Wrapper-side relayout; negligible at 16x16 — fold into the kernel or
    # accept NHWC I/O if shapes grow.)
    x = jnp.transpose(image_nchw, (0, 2, 3, 1)).reshape(N, H, wci)
    b1 = _band_weights(w1, W)          # (3, W*C_in,  W*C_out)
    b2 = _band_weights(w2, W)          # (3, W*C_out, W*C_out)

    kernel = functools.partial(_conv_block_kernel, H=H, W=W, C_in=C_in,
                               C_out=C_out, eps=1e-5, neg_slope=0.2)

    flops = 6 * int(N) * H * wco * (wci + wco)        # 3 matmuls per stage
    bytes_accessed = 4 * (x.size + int(N) * H * wco + b1.size + b2.size)

    out = pl.pallas_call(
        kernel,
        out_shape=jax.ShapeDtypeStruct((N, H, wco), jnp.float32),
        grid_spec=pltpu.PrefetchScalarGridSpec(
            num_scalar_prefetch=0,
            grid=(N,),
            in_specs=[
                pl.BlockSpec((1, H, wci), lambda n: (n, 0, 0)),
                pl.BlockSpec((3, wci, wco), lambda n: (0, 0, 0)),
                pl.BlockSpec((3, wco, wco), lambda n: (0, 0, 0)),
            ],
            out_specs=pl.BlockSpec((1, H, wco), lambda n: (n, 0, 0)),
            scratch_shapes=[
                pltpu.VMEM((H + 2, wci), jnp.float32),
                pltpu.VMEM((H + 2, wco), jnp.float32),
            ],
        ),
        compiler_params=pltpu.CompilerParams(
            dimension_semantics=("parallel",)),
        cost_estimate=pl.CostEstimate(
            flops=int(flops),
            transcendentals=2 * int(N) * wco,
            bytes_accessed=int(bytes_accessed)),
        interpret=interpret,
    )(x, b1, b2)

    # (N, H, W*C_out) -> NHWC -> NCHW
    return jnp.transpose(out.reshape(N, H, W, C_out), (0, 3, 1, 2))


def _reference(image_nchw, w1, w2, eps=1e-5, neg_slope=0.2):
    """Pure-JAX reference (Conv2d -> InstanceNorm2d -> LeakyReLU) x 2."""
    def stage(x, w):
        y = jax.lax.conv_general_dilated(
            x, w, window_strides=(1, 1), padding="SAME",
            dimension_numbers=("NCHW", "HWIO", "NCHW"))
        mean = jnp.mean(y, axis=(2, 3), keepdims=True)
        var = jnp.mean((y - mean) ** 2, axis=(2, 3), keepdims=True)
        y = (y - mean) * jax.lax.rsqrt(var + eps)
        return jnp.where(y >= 0, y, neg_slope * y)

    return stage(stage(image_nchw, w1), w2)


if __name__ == "__main__":
    # Shapes consistent with the module: N=2, in_chans=4, out_chans=8, 16x16.
    N, in_chans, out_chans, Hdim, Wdim = 2, 4, 8, 16, 16
    drop_prob = 0.1

    key = jax.random.PRNGKey(0)
    k_x, k_w1, k_w2 = jax.random.split(key, 3)

    image = jax.random.normal(k_x, (N, in_chans, Hdim, Wdim), dtype=jnp.float32)
    w1 = 0.1 * jax.random.normal(k_w1, (3, 3, in_chans, out_chans), dtype=jnp.float32)
    w2 = 0.1 * jax.random.normal(k_w2, (3, 3, out_chans, out_chans), dtype=jnp.float32)

    fwd = jax.jit(functools.partial(conv_block, drop_prob=drop_prob))
    out = jax.block_until_ready(fwd(image, w1, w2))

    assert out.shape == (N, out_chans, Hdim, Wdim), out.shape
    assert bool(jnp.all(jnp.isfinite(out)))

    ref = _reference(image, w1, w2)
    err = float(jnp.max(jnp.abs(out - ref)))
    assert err < 2e-3, f"max abs error vs reference: {err}"

    print("KERNEL_OK")
</pallas_src>

<mosaic_0001>
module attributes {stable_mosaic.version = 11 : i64} {
  func.func @_conv_block_kernel(%arg0: i32, %arg1: memref<1x16x64xf32, #tpu.memory_space<vmem>>, %arg2: memref<3x64x128xf32, #tpu.memory_space<vmem>>, %arg3: memref<3x128x128xf32, #tpu.memory_space<vmem>>, %arg4: memref<1x16x128xf32, #tpu.memory_space<vmem>>, %arg5: memref<18x64xf32, #tpu.memory_space<vmem>>, %arg6: memref<18x128xf32, #tpu.memory_space<vmem>>) attributes {dimension_semantics = [#tpu.dimension_semantics<parallel>], iteration_bounds = array<i64: 2>, scalar_prefetch = 0 : i64, scratch_operands = 2 : i64, tpu.core_type = #tpu.core_type<tc>, window_params = [{transform_indices = @transform_0, window_bounds = array<i64: 1, 16, 64>}, {pipeline_mode = #tpu.pipeline_mode<synchronous>, transform_indices = @transform_1, window_bounds = array<i64: 3, 64, 128>}, {pipeline_mode = #tpu.pipeline_mode<synchronous>, transform_indices = @transform_2, window_bounds = array<i64: 3, 128, 128>}, {transform_indices = @transform_3, window_bounds = array<i64: 1, 16, 128>}]} {
    %cst = arith.constant 0.000000e+00 : f32
    %0 = vector.broadcast %cst : f32 to vector<1x64xf32>
    %cst_0 = arith.constant 0.000000e+00 : f32
    %1 = vector.broadcast %cst_0 : f32 to vector<1x128xf32>
    %c0 = arith.constant 0 : index
    %c0_1 = arith.constant 0 : index
    %2 = vector.load %arg5[%c0, %c0_1] : memref<18x64xf32, #tpu.memory_space<vmem>>, vector<1x64xf32>
    tpu.vector_store %arg5[%c0, %c0_1], %0 {strides = array<i32>} : memref<18x64xf32, #tpu.memory_space<vmem>>, vector<1x64xf32>,
    %c17 = arith.constant 17 : index
    %c0_2 = arith.constant 0 : index
    %3 = vector.load %arg5[%c17, %c0_2] : memref<18x64xf32, #tpu.memory_space<vmem>>, vector<1x64xf32>
    tpu.vector_store %arg5[%c17, %c0_2], %0 {strides = array<i32>} : memref<18x64xf32, #tpu.memory_space<vmem>>, vector<1x64xf32>,
    %c0_3 = arith.constant 0 : index
    %c0_4 = arith.constant 0 : index
    %4 = vector.load %arg6[%c0_3, %c0_4] : memref<18x128xf32, #tpu.memory_space<vmem>>, vector<1x128xf32>
    tpu.vector_store %arg6[%c0_3, %c0_4], %1 {strides = array<i32>} : memref<18x128xf32, #tpu.memory_space<vmem>>, vector<1x128xf32>,
    %c17_5 = arith.constant 17 : index
    %c0_6 = arith.constant 0 : index
    %5 = vector.load %arg6[%c17_5, %c0_6] : memref<18x128xf32, #tpu.memory_space<vmem>>, vector<1x128xf32>
    tpu.vector_store %arg6[%c17_5, %c0_6], %1 {strides = array<i32>} : memref<18x128xf32, #tpu.memory_space<vmem>>, vector<1x128xf32>,
    %c0_7 = arith.constant 0 : index
    %c0_8 = arith.constant 0 : index
    %c0_9 = arith.constant 0 : index
    %6 = vector.load %arg1[%c0_7, %c0_8, %c0_9] : memref<1x16x64xf32, #tpu.memory_space<vmem>>, vector<1x16x64xf32>
    %7 = vector.shape_cast %6 : vector<1x16x64xf32> to vector<16x64xf32>
    %c1 = arith.constant 1 : index
    %c0_10 = arith.constant 0 : index
    %8 = vector.load %arg5[%c1, %c0_10] : memref<18x64xf32, #tpu.memory_space<vmem>>, vector<16x64xf32>
    tpu.vector_store %arg5[%c1, %c0_10], %7 {strides = array<i32>} : memref<18x64xf32, #tpu.memory_space<vmem>>, vector<16x64xf32>,
    %cst_11 = arith.constant 0.000000e+00 : f32
    %9 = vector.broadcast %cst_11 : f32 to vector<16x128xf32>
    %c0_12 = arith.constant 0 : index
    %c0_13 = arith.constant 0 : index
    %10 = vector.load %arg5[%c0_12, %c0_13] : memref<18x64xf32, #tpu.memory_space<vmem>>, vector<16x64xf32>
    %c0_14 = arith.constant 0 : index
    %c0_15 = arith.constant 0 : index
    %c0_16 = arith.constant 0 : index
    %11 = vector.load %arg2[%c0_14, %c0_15, %c0_16] : memref<3x64x128xf32, #tpu.memory_space<vmem>>, vector<1x64x128xf32>
    %12 = vector.shape_cast %11 : vector<1x64x128xf32> to vector<64x128xf32>
    %cst_17 = arith.constant dense<0.000000e+00> : vector<16x128xf32>
    %13 = tpu.matmul %10, %12, %cst_17 {dimension_numbers = #tpu.dot_dimension_numbers<[1], [0], [0], [1], [0, 0, 1, 1], [], []>} : vector<16x64xf32>, vector<64x128xf32>, vector<16x128xf32> -> vector<16x128xf32>
    %14 = arith.addf %9, %13 : vector<16x128xf32>
    %c1_18 = arith.constant 1 : index
    %c0_19 = arith.constant 0 : index
    %15 = vector.load %arg5[%c1_18, %c0_19] : memref<18x64xf32, #tpu.memory_space<vmem>>, vector<16x64xf32>
    %c1_20 = arith.constant 1 : index
    %c0_21 = arith.constant 0 : index
    %c0_22 = arith.constant 0 : index
    %16 = vector.load %arg2[%c1_20, %c0_21, %c0_22] : memref<3x64x128xf32, #tpu.memory_space<vmem>>, vector<1x64x128xf32>
    %17 = vector.shape_cast %16 : vector<1x64x128xf32> to vector<64x128xf32>
    %cst_23 = arith.constant dense<0.000000e+00> : vector<16x128xf32>
    %18 = tpu.matmul %15, %17, %cst_23 {dimension_numbers = #tpu.dot_dimension_numbers<[1], [0], [0], [1], [0, 0, 1, 1], [], []>} : vector<16x64xf32>, vector<64x128xf32>, vector<16x128xf32> -> vector<16x128xf32>
    %19 = arith.addf %14, %18 : vector<16x128xf32>
    %c2 = arith.constant 2 : index
    %c0_24 = arith.constant 0 : index
    %20 = vector.load %arg5[%c2, %c0_24] : memref<18x64xf32, #tpu.memory_space<vmem>>, vector<16x64xf32>
    %c2_25 = arith.constant 2 : index
    %c0_26 = arith.constant 0 : index
    %c0_27 = arith.constant 0 : index
    %21 = vector.load %arg2[%c2_25, %c0_26, %c0_27] : memref<3x64x128xf32, #tpu.memory_space<vmem>>, vector<1x64x128xf32>
    %22 = vector.shape_cast %21 : vector<1x64x128xf32> to vector<64x128xf32>
    %cst_28 = arith.constant dense<0.000000e+00> : vector<16x128xf32>
    %23 = tpu.matmul %20, %22, %cst_28 {dimension_numbers = #tpu.dot_dimension_numbers<[1], [0], [0], [1], [0, 0, 1, 1], [], []>} : vector<16x64xf32>, vector<64x128xf32>, vector<16x128xf32> -> vector<16x128xf32>
    %24 = arith.addf %19, %23 : vector<16x128xf32>
    %cst_29 = arith.constant dense<0.000000e+00> : vector<128xf32>
    %25 = vector.multi_reduction <add>, %24, %cst_29 [0] : vector<16x128xf32> to vector<128xf32>
    %26 = vector.shape_cast %25 : vector<128xf32> to vector<1x128xf32>
    %c64_i32 = arith.constant 64 : i32
    %27 = tpu.dynamic_rotate %26 by %c64_i32 dim 1 : vector<1x128xf32>, i32 -> vector<1x128xf32>
    %28 = arith.addf %26, %27 : vector<1x128xf32>
    %c32_i32 = arith.constant 32 : i32
    %29 = tpu.dynamic_rotate %28 by %c32_i32 dim 1 : vector<1x128xf32>, i32 -> vector<1x128xf32>
    %30 = arith.addf %28, %29 : vector<1x128xf32>
    %c16_i32 = arith.constant 16 : i32
    %31 = tpu.dynamic_rotate %30 by %c16_i32 dim 1 : vector<1x128xf32>, i32 -> vector<1x128xf32>
    %32 = arith.addf %30, %31 : vector<1x128xf32>
    %c8_i32 = arith.constant 8 : i32
    %33 = tpu.dynamic_rotate %32 by %c8_i32 dim 1 : vector<1x128xf32>, i32 -> vector<1x128xf32>
    %34 = arith.addf %32, %33 : vector<1x128xf32>
    %cst_30 = arith.constant 3.906250e-03 : f32
    %35 = vector.broadcast %cst_30 : f32 to vector<1x128xf32>
    %36 = arith.mulf %34, %35 : vector<1x128xf32>
    %37 = vector.broadcast %36 : vector<1x128xf32> to vector<16x128xf32>
    %38 = arith.subf %24, %37 : vector<16x128xf32>
    %39 = arith.mulf %38, %38 : vector<16x128xf32>
    %cst_31 = arith.constant dense<0.000000e+00> : vector<128xf32>
    %40 = vector.multi_reduction <add>, %39, %cst_31 [0] : vector<16x128xf32> to vector<128xf32>
    %41 = vector.shape_cast %40 : vector<128xf32> to vector<1x128xf32>
    %c64_i32_32 = arith.constant 64 : i32
    %42 = tpu.dynamic_rotate %41 by %c64_i32_32 dim 1 : vector<1x128xf32>, i32 -> vector<1x128xf32>
    %43 = arith.addf %41, %42 : vector<1x128xf32>
    %c32_i32_33 = arith.constant 32 : i32
    %44 = tpu.dynamic_rotate %43 by %c32_i32_33 dim 1 : vector<1x128xf32>, i32 -> vector<1x128xf32>
    %45 = arith.addf %43, %44 : vector<1x128xf32>
    %c16_i32_34 = arith.constant 16 : i32
    %46 = tpu.dynamic_rotate %45 by %c16_i32_34 dim 1 : vector<1x128xf32>, i32 -> vector<1x128xf32>
    %47 = arith.addf %45, %46 : vector<1x128xf32>
    %c8_i32_35 = arith.constant 8 : i32
    %48 = tpu.dynamic_rotate %47 by %c8_i32_35 dim 1 : vector<1x128xf32>, i32 -> vector<1x128xf32>
    %49 = arith.addf %47, %48 : vector<1x128xf32>
    %cst_36 = arith.constant 3.906250e-03 : f32
    %50 = vector.broadcast %cst_36 : f32 to vector<1x128xf32>
    %51 = arith.mulf %49, %50 : vector<1x128xf32>
    %cst_37 = arith.constant 9.99999974E-6 : f32
    %52 = vector.broadcast %cst_37 : f32 to vector<1x128xf32>
    %53 = arith.addf %51, %52 : vector<1x128xf32>
    %54 = math.rsqrt %53 : vector<1x128xf32>
    %55 = vector.broadcast %54 : vector<1x128xf32> to vector<16x128xf32>
    %56 = arith.mulf %38, %55 : vector<16x128xf32>
    %cst_38 = arith.constant 0.000000e+00 : f32
    %57 = vector.broadcast %cst_38 : f32 to vector<16x128xf32>
    %58 = arith.cmpf oge, %56, %57 : vector<16x128xf32>
    %cst_39 = arith.constant 2.000000e-01 : f32
    %59 = vector.broadcast %cst_39 : f32 to vector<16x128xf32>
    %60 = arith.mulf %59, %56 : vector<16x128xf32>
    %61 = arith.select %58, %56, %60 : vector<16x128xi1>, vector<16x128xf32>
    %c1_40 = arith.constant 1 : index
    %c0_41 = arith.constant 0 : index
    %62 = vector.load %arg6[%c1_40, %c0_41] : memref<18x128xf32, #tpu.memory_space<vmem>>, vector<16x128xf32>
    tpu.vector_store %arg6[%c1_40, %c0_41], %61 {strides = array<i32>} : memref<18x128xf32, #tpu.memory_space<vmem>>, vector<16x128xf32>,
    %cst_42 = arith.constant 0.000000e+00 : f32
    %63 = vector.broadcast %cst_42 : f32 to vector<16x128xf32>
    %c0_43 = arith.constant 0 : index
    %c0_44 = arith.constant 0 : index
    %64 = vector.load %arg6[%c0_43, %c0_44] : memref<18x128xf32, #tpu.memory_space<vmem>>, vector<16x128xf32>
    %c0_45 = arith.constant 0 : index
    %c0_46 = arith.constant 0 : index
    %c0_47 = arith.constant 0 : index
    %65 = vector.load %arg3[%c0_45, %c0_46, %c0_47] : memref<3x128x128xf32, #tpu.memory_space<vmem>>, vector<1x128x128xf32>
    %66 = vector.shape_cast %65 : vector<1x128x128xf32> to vector<128x128xf32>
    %cst_48 = arith.constant dense<0.000000e+00> : vector<16x128xf32>
    %67 = tpu.matmul %64, %66, %cst_48 {dimension_numbers = #tpu.dot_dimension_numbers<[1], [0], [0], [1], [0, 0, 1, 1], [], []>} : vector<16x128xf32>, vector<128x128xf32>, vector<16x128xf32> -> vector<16x128xf32>
    %68 = arith.addf %63, %67 : vector<16x128xf32>
    %c1_49 = arith.constant 1 : index
    %c0_50 = arith.constant 0 : index
    %69 = vector.load %arg6[%c1_49, %c0_50] : memref<18x128xf32, #tpu.memory_space<vmem>>, vector<16x128xf32>
    %c1_51 = arith.constant 1 : index
    %c0_52 = arith.constant 0 : index
    %c0_53 = arith.constant 0 : index
    %70 = vector.load %arg3[%c1_51, %c0_52, %c0_53] : memref<3x128x128xf32, #tpu.memory_space<vmem>>, vector<1x128x128xf32>
    %71 = vector.shape_cast %70 : vector<1x128x128xf32> to vector<128x128xf32>
    %cst_54 = arith.constant dense<0.000000e+00> : vector<16x128xf32>
    %72 = tpu.matmul %69, %71, %cst_54 {dimension_numbers = #tpu.dot_dimension_numbers<[1], [0], [0], [1], [0, 0, 1, 1], [], []>} : vector<16x128xf32>, vector<128x128xf32>, vector<16x128xf32> -> vector<16x128xf32>
    %73 = arith.addf %68, %72 : vector<16x128xf32>
    %c2_55 = arith.constant 2 : index
    %c0_56 = arith.constant 0 : index
    %74 = vector.load %arg6[%c2_55, %c0_56] : memref<18x128xf32, #tpu.memory_space<vmem>>, vector<16x128xf32>
    %c2_57 = arith.constant 2 : index
    %c0_58 = arith.constant 0 : index
    %c0_59 = arith.constant 0 : index
    %75 = vector.load %arg3[%c2_57, %c0_58, %c0_59] : memref<3x128x128xf32, #tpu.memory_space<vmem>>, vector<1x128x128xf32>
    %76 = vector.shape_cast %75 : vector<1x128x128xf32> to vector<128x128xf32>
    %cst_60 = arith.constant dense<0.000000e+00> : vector<16x128xf32>
    %77 = tpu.matmul %74, %76, %cst_60 {dimension_numbers = #tpu.dot_dimension_numbers<[1], [0], [0], [1], [0, 0, 1, 1], [], []>} : vector<16x128xf32>, vector<128x128xf32>, vector<16x128xf32> -> vector<16x128xf32>
    %78 = arith.addf %73, %77 : vector<16x128xf32>
    %cst_61 = arith.constant dense<0.000000e+00> : vector<128xf32>
    %79 = vector.multi_reduction <add>, %78, %cst_61 [0] : vector<16x128xf32> to vector<128xf32>
    %80 = vector.shape_cast %79 : vector<128xf32> to vector<1x128xf32>
    %c64_i32_62 = arith.constant 64 : i32
    %81 = tpu.dynamic_rotate %80 by %c64_i32_62 dim 1 : vector<1x128xf32>, i32 -> vector<1x128xf32>
    %82 = arith.addf %80, %81 : vector<1x128xf32>
    %c32_i32_63 = arith.constant 32 : i32
    %83 = tpu.dynamic_rotate %82 by %c32_i32_63 dim 1 : vector<1x128xf32>, i32 -> vector<1x128xf32>
    %84 = arith.addf %82, %83 : vector<1x128xf32>
    %c16_i32_64 = arith.constant 16 : i32
    %85 = tpu.dynamic_rotate %84 by %c16_i32_64 dim 1 : vector<1x128xf32>, i32 -> vector<1x128xf32>
    %86 = arith.addf %84, %85 : vector<1x128xf32>
    %c8_i32_65 = arith.constant 8 : i32
    %87 = tpu.dynamic_rotate %86 by %c8_i32_65 dim 1 : vector<1x128xf32>, i32 -> vector<1x128xf32>
    %88 = arith.addf %86, %87 : vector<1x128xf32>
    %cst_66 = arith.constant 3.906250e-03 : f32
    %89 = vector.broadcast %cst_66 : f32 to vector<1x128xf32>
    %90 = arith.mulf %88, %89 : vector<1x128xf32>
    %91 = vector.broadcast %90 : vector<1x128xf32> to vector<16x128xf32>
    %92 = arith.subf %78, %91 : vector<16x128xf32>
    %93 = arith.mulf %92, %92 : vector<16x128xf32>
    %cst_67 = arith.constant dense<0.000000e+00> : vector<128xf32>
    %94 = vector.multi_reduction <add>, %93, %cst_67 [0] : vector<16x128xf32> to vector<128xf32>
    %95 = vector.shape_cast %94 : vector<128xf32> to vector<1x128xf32>
    %c64_i32_68 = arith.constant 64 : i32
    %96 = tpu.dynamic_rotate %95 by %c64_i32_68 dim 1 : vector<1x128xf32>, i32 -> vector<1x128xf32>
    %97 = arith.addf %95, %96 : vector<1x128xf32>
    %c32_i32_69 = arith.constant 32 : i32
    %98 = tpu.dynamic_rotate %97 by %c32_i32_69 dim 1 : vector<1x128xf32>, i32 -> vector<1x128xf32>
    %99 = arith.addf %97, %98 : vector<1x128xf32>
    %c16_i32_70 = arith.constant 16 : i32
    %100 = tpu.dynamic_rotate %99 by %c16_i32_70 dim 1 : vector<1x128xf32>, i32 -> vector<1x128xf32>
    %101 = arith.addf %99, %100 : vector<1x128xf32>
    %c8_i32_71 = arith.constant 8 : i32
    %102 = tpu.dynamic_rotate %101 by %c8_i32_71 dim 1 : vector<1x128xf32>, i32 -> vector<1x128xf32>
    %103 = arith.addf %101, %102 : vector<1x128xf32>
    %cst_72 = arith.constant 3.906250e-03 : f32
    %104 = vector.broadcast %cst_72 : f32 to vector<1x128xf32>
    %105 = arith.mulf %103, %104 : vector<1x128xf32>
    %cst_73 = arith.constant 9.99999974E-6 : f32
    %106 = vector.broadcast %cst_73 : f32 to vector<1x128xf32>
    %107 = arith.addf %105, %106 : vector<1x128xf32>
    %108 = math.rsqrt %107 : vector<1x128xf32>
    %109 = vector.broadcast %108 : vector<1x128xf32> to vector<16x128xf32>
    %110 = arith.mulf %92, %109 : vector<16x128xf32>
    %cst_74 = arith.constant 0.000000e+00 : f32
    %111 = vector.broadcast %cst_74 : f32 to vector<16x128xf32>
    %112 = arith.cmpf oge, %110, %111 : vector<16x128xf32>
    %cst_75 = arith.constant 2.000000e-01 : f32
    %113 = vector.broadcast %cst_75 : f32 to vector<16x128xf32>
    %114 = arith.mulf %113, %110 : vector<16x128xf32>
    %115 = arith.select %112, %110, %114 : vector<16x128xi1>, vector<16x128xf32>
    %c0_76 = arith.constant 0 : index
    %c0_77 = arith.constant 0 : index
    %c0_78 = arith.constant 0 : index
    %116 = vector.load %arg4[%c0_76, %c0_77, %c0_78] : memref<1x16x128xf32, #tpu.memory_space<vmem>>, vector<1x16x128xf32>
    %117 = vector.shape_cast %116 : vector<1x16x128xf32> to vector<16x128xf32>
    %118 = vector.shape_cast %115 : vector<16x128xf32> to vector<1x16x128xf32>
    tpu.vector_store %arg4[%c0_76, %c0_77, %c0_78], %118 {strides = array<i32>} : memref<1x16x128xf32, #tpu.memory_space<vmem>>, vector<1x16x128xf32>,
    return
  }
  func.func @transform_0(%arg0: i32) -> (i32, i32, i32) {
    %c0_i32 = arith.constant 0 : i32
    %c0_i32_0 = arith.constant 0 : i32
    %c0_i32_1 = arith.constant 0 : i32
    return %arg0, %c0_i32, %c0_i32_0 : i32, i32, i32
  }
  func.func @transform_1(%arg0: i32) -> (i32, i32, i32) {
    %c0_i32 = arith.constant 0 : i32
    %c0_i32_0 = arith.constant 0 : i32
    %c0_i32_1 = arith.constant 0 : i32
    %c0_i32_2 = arith.constant 0 : i32
    return %c0_i32, %c0_i32_0, %c0_i32_1 : i32, i32, i32
  }
  func.func @transform_2(%arg0: i32) -> (i32, i32, i32) {
    %c0_i32 = arith.constant 0 : i32
    %c0_i32_0 = arith.constant 0 : i32
    %c0_i32_1 = arith.constant 0 : i32
    %c0_i32_2 = arith.constant 0 : i32
    return %c0_i32, %c0_i32_0, %c0_i32_1 : i32, i32, i32
  }
  func.func @transform_3(%arg0: i32) -> (i32, i32, i32) {
    %c0_i32 = arith.constant 0 : i32
    %c0_i32_0 = arith.constant 0 : i32
    %c0_i32_1 = arith.constant 0 : i32
    return %arg0, %c0_i32, %c0_i32_0 : i32, i32, i32
  }
}

</mosaic_0001>

<bundles_post_ra>
// kernel: conv_block.1
= control target key start
LH: loop header
LB: loop body
LE: loop exit
PB: predicated region body
PF: predicated region fallthrough
CT: control target
= control target key end

     0   :  { %s1439_s12 = smov 0   ;;  %s1719_s0 = inlined_call_operand.vmem [shape: f32[2,16,64], index: 0, kind: input, shape index: {}]   ;;  %s1720_s1 = inlined_call_operand.vmem [shape: f32[3,64,128], index: 1, kind: input, shape index: {}]   ;;  %s1721_s2 = inlined_call_operand.vmem [shape: f32[3,128,128], index: 2, kind: input, shape index: {}]   ;;  %s1722_s3 = inlined_call_operand.vmem [shape: f32[2,16,128], index: 3, kind: output, shape index: {}]  }
   0x1 LB: > { %s924_s13 = sadd.s32 4294967295, %s1412_s12   ;;  %p928_p0 = scmp.ge.s32.totalorder %s1412_s12, 1  ;;  %s1412_s12 = sphi %s1439_s12, %s13_s12  }
   0x2   : > { %p137_p1 = scmp.lt.s32.totalorder %s1412_s12, 3 }
   0x4   : > { %p138_p2 = pnand %p928_p0, %p137_p1 }
   0x5   : > { %v933_v0 = vld [vmem:[%s1720_s1 + $0x40] sm:$0xff] (!%p138_p2)  ;;  %v934_v1 = vld [vmem:[%s1720_s1 + $0x48] sm:$0xff] (!%p138_p2)  ;;  %v935_v2 = vld [vmem:[%s1720_s1 + $0x50] sm:$0xff] (!%p138_p2)  ;;  %p161_p3 = scmp.lt.s32.totalorder (!%p138_p2), %s924_s13, 1  ;;  %vm171_vm0 = vcmask (!%p138_p2), 516096   ;;  %v1414_v8 = vmov (!%p138_p2), 0.0   ;;  %v478_v60 = vlaneseq (!%p138_p2) }
   0x6   : > { %141 = sbr.rel (%p138_p2) target bundleno = 2516 (0x9d4), region = 32  ;;  %v1237_v3 = vpack.c.bf16 (!%p138_p2), %v934_v1, %v933_v0  ;;  %v936_v4 = vld [vmem:[%s1720_s1 + $0x58] sm:$0xff] (!%p138_p2)  ;;  %v937_v6 = vld [vmem:[%s1720_s1 + $0x60] sm:$0xff] (!%p138_p2)  ;;  %v938_v7 = vld [vmem:[%s1720_s1 + $0x68] sm:$0xff] (!%p138_p2)  ;;  %172 = vst.msk [vmem:[#allocation2] sm:$0x1] (!%p138_p2), %vm171_vm0, %v1414_v8 }
   0x7   : > { %v1241_v5 = vpack.c.bf16 (!%p138_p2), %v936_v4, %v935_v2  ;;  %173 = vst.msk [vmem:[#allocation2 + $0x11] sm:$0x1] (!%p138_p2), %vm171_vm0, %v1414_v8  ;;  %174 = vst [vmem:[#allocation3] sm:$0x1] (!%p138_p2), %v1414_v8  ;;  %vm178_vm1 = vcmask (!%p138_p2), 523264   ;;  %v1245_v9 = vpack.c.bf16 (!%p138_p2), %v938_v7, %v937_v6  ;;  %v939_v10 = vld [vmem:[%s1720_s1 + $0x70] sm:$0xff] (!%p138_p2) }
   0x8   : > { %175 = vst [vmem:[#allocation3 + $0x11] sm:$0x1] (!%p138_p2), %v1414_v8  ;;  %1238 = vmatprep.subr.bf16.mxu0 (!%p138_p2), %v1237_v3  ;;  %v940_v11 = vld [vmem:[%s1720_s1 + $0x78] sm:$0xff] (!%p138_p2)  ;;  %v183_v15 = vld [vmem:[%s1720_s1] sm:$0xff] (!%p138_p2)  ;;  %v184_v16 = vld [vmem:[%s1720_s1 + $0x8] sm:$0xff] (!%p138_p2)  ;;  %s1415_s17 = smov (!%p138_p2), 64  }
   0x9   : > { %1240 = vmatpush3.bf16.msra.mxu0 (!%p138_p2), %v1237_v3  ;;  %v1249_v14 = vpack.c.bf16 (!%p138_p2), %v940_v11, %v939_v10  ;;  %v1253_v17 = vpack.c.bf16 (!%p138_p2), %v184_v16, %v183_v15  ;;  %v185_v19 = vld [vmem:[%s1720_s1 + $0x10] sm:$0xff] (!%p138_p2)  ;;  %v186_v20 = vld [vmem:[%s1720_s1 + $0x18] sm:$0xff] (!%p138_p2)  ;;  %v187_v24 = vld [vmem:[%s1720_s1 + $0x20] sm:$0xff] (!%p138_p2)  ;;  %s1416_s18 = smov (!%p138_p2), 32   ;;  %s1417_s19 = smov (!%p138_p2), 16   ;;  %v479_v61 = vshrl.u32 (!%p138_p2), %v478_v60, 7 }
   0xa   : > { %1242 = vmatprep.subr.bf16.mxu0 (!%p138_p2), %v1241_v5  ;;  %v1257_v22 = vpack.c.bf16 (!%p138_p2), %v186_v20, %v185_v19  ;;  %v188_v25 = vld [vmem:[%s1720_s1 + $0x28] sm:$0xff] (!%p138_p2)  ;;  %v189_v27 = vld [vmem:[%s1720_s1 + $0x30] sm:$0xff] (!%p138_p2)  ;;  %v190_v28 = vld [vmem:[%s1720_s1 + $0x38] sm:$0xff] (!%p138_p2)  ;;  %s1418_s20 = smov (!%p138_p2), 8  }
   0xb   : > { %v1261_v26 = vpack.c.bf16 (!%p138_p2), %v188_v25, %v187_v24  ;;  %v1265_v29 = vpack.c.bf16 (!%p138_p2), %v190_v28, %v189_v27  ;;  %v945_v30 = vld [vmem:[%s1720_s1 + $0x80] sm:$0xff] (!%p138_p2)  ;;  %v946_v31 = vld [vmem:[%s1720_s1 + $0x88] sm:$0xff] (!%p138_p2)  ;;  %v947_v33 = vld [vmem:[%s1720_s1 + $0x90] sm:$0xff] (!%p138_p2)  ;;  %v1539_v63 = vsub.s32 (!%p138_p2), 0, %v479_v61 }
   0xc   : > { %v1269_v32 = vpack.c.bf16 (!%p138_p2), %v946_v31, %v945_v30  ;;  %v948_v34 = vld [vmem:[%s1720_s1 + $0x98] sm:$0xff] (!%p138_p2)  ;;  %v949_v38 = vld [vmem:[%s1720_s1 + $0xa0] sm:$0xff] (!%p138_p2)  ;;  %v950_v39 = vld [vmem:[%s1720_s1 + $0xa8] sm:$0xff] (!%p138_p2) }
   0xd   : > { %s1724_s13 = smov (!%p161_p3, %s924_s13), 1  ;;  %1244 = vmatpush3.bf16.msra.mxu0 %v1241_v5  ;;  %v1273_v36 = vpack.c.bf16 %v948_v34, %v947_v33  ;;  %v1277_v40 = vpack.c.bf16 %v950_v39, %v949_v38  ;;  %v951_v41 = vld [vmem:[%s1720_s1 + $0xb0] sm:$0xff]  ;;  %v952_v42 = vld [vmem:[%s1720_s1 + $0xb8] sm:$0xff]  ;;  %v956_v19 = vld [vmem:[%s1721_s2 + $0x88] sm:$0xff] }
   0xe   : > { %s989_s26 = sshll.u32 %s1724_s13, 4  ;;  %1246 = vmatprep.subr.bf16.mxu0 %v1245_v9  ;;  %v1281_v43 = vpack.c.bf16 %v952_v42, %v951_v41  ;;  %v524_v24 = vld [vmem:[%s1721_s2] sm:$0xff]  ;;  %v525_v25 = vld [vmem:[%s1721_s2 + $0x8] sm:$0xff]  ;;  %v526_v30 = vld [vmem:[%s1721_s2 + $0x10] sm:$0xff] }
   0xf   : > { %s165_s4 = scalar_lea.vmem %s1719_s0, %s989_s26  ;;  %v959_v27 = vld [vmem:[%s1721_s2 + $0xa0] sm:$0xff]  ;;  %v960_v28 = vld [vmem:[%s1721_s2 + $0xa8] sm:$0xff]  ;;  %v527_v31 = vld [vmem:[%s1721_s2 + $0x18] sm:$0xff]  ;;  %s170_s11 = scalar_lea.vmem %s1722_s3, %s989_s26 }
  0x10   : > { %v176_v12 = vld [vmem:[%s165_s4] sm:$0xff]  ;;  %v177_v13 = vld [vmem:[%s165_s4 + $0x8] sm:$0xff]  ;;  %v961_v33 = vld [vmem:[%s1721_s2 + $0xb0] sm:$0xff] }
  0x11   : > { %179 = vst.msk [vmem:[#allocation2 + $0x1] sm:$0xff] %vm178_vm1, %v176_v12  ;;  %180 = vst.msk [vmem:[#allocation2 + $0x9] sm:$0xff] %vm178_vm1, %v177_v13  ;;  %1248 = vmatpush3.bf16.msra.mxu0 %v1245_v9  ;;  %v962_v34 = vld [vmem:[%s1721_s2 + $0xb8] sm:$0xff]  ;;  %v963_v39 = vld [vmem:[%s1721_s2 + $0xc0] sm:$0xff] }
  0x12   : > { %1250 = vmatprep.subr.bf16.mxu0 %v1249_v14  ;;  %v530_v42 = vld [vmem:[%s1721_s2 + $0x30] sm:$0xff]  ;;  %v970_v60 = vld [vmem:[%s1721_s2 + $0xf8] sm:$0xff] }
  0x15   : > { %1252 = vmatpush3.bf16.msra.mxu0 %v1249_v14 }
  0x16   : > { %1254 = vmatprep.subr.bf16.mxu0 %v1253_v17 }
  0x18   : > { %v191_v18 = vld [vmem:[#allocation2 + $0x1] sm:$0xff]  ;;  %v192_v21 = vld [vmem:[#allocation2 + $0x9] sm:$0xff] }
  0x19   : > { %1091 = vmatprep.mubr.msk.f32.mxu0 %vm178_vm1, %v191_v18  ;;  %v181_v23 = vld [vmem:[#allocation2] sm:$0xff]  ;;  %v182_v35 = vld [vmem:[#allocation2 + $0x8] sm:$0xff] }
  0x1a   : > { %1092 = vmatmul.mubr.msk.f32.vlgmr.msra.gmra.mrb[0].mxu0 %vm178_vm1, %v192_v21  ;;  %v364_v37 = vld [vmem:[#allocation2 + $0x2] sm:$0xff]  ;;  %v365_v44 = vld [vmem:[#allocation2 + $0xa] sm:$0xff] }
  0x1b   : > { %1256 = vmatpush3.bf16.msra.mxu0 %v1253_v17  ;;  %1110 = vmatprep.mubr.msk.f32.mxu0 %vm178_vm1, %v181_v23  ;;  %v955_v18 = vld [vmem:[%s1721_s2 + $0x80] sm:$0xff]  ;;  %v957_v21 = vld [vmem:[%s1721_s2 + $0x90] sm:$0xff] }
  0x1c   : > { %1258 = vmatprep.subr.bf16.mxu0 %v1257_v22  ;;  %v1285_v20 = vpack.c.bf16 %v956_v19, %v955_v18 }
  0x1f   : > { %1260 = vmatpush3.bf16.msra.mxu0 %v1257_v22  ;;  %v958_v22 = vld [vmem:[%s1721_s2 + $0x98] sm:$0xff] }
  0x20   : > { %1262 = vmatprep.subr.bf16.mxu0 %v1261_v26  ;;  %v1289_v23 = vpack.c.bf16 %v958_v22, %v957_v21  ;;  %v973_v22 = vld [vmem:[%s1721_s2 + $0x110] sm:$0xff] }
  0x23   : > { %1264 = vmatpush3.bf16.msra.mxu0 %v1261_v26  ;;  %v1317_v26 = vpack.c.bf16 %v525_v25, %v524_v24  ;;  %v975_v25 = vld [vmem:[%s1721_s2 + $0x120] sm:$0xff] }
  0x24   : > { %1266 = vmatprep.subr.bf16.mxu0 %v1265_v29 }
  0x25   : > { %1318 = vmatprep.subr.bf16.mxu1 %v1317_v26 }
  0x26   : > { %1320 = vmatpush3.bf16.msra.mxu1 %v1317_v26  ;;  %v976_v26 = vld [vmem:[%s1721_s2 + $0x128] sm:$0xff] }
  0x27   : > { %1268 = vmatpush3.bf16.msra.mxu0 %v1265_v29  ;;  %v1293_v29 = vpack.c.bf16 %v960_v28, %v959_v27  ;;  %v1357_v28 = vpack.c.bf16 %v976_v26, %v975_v25 }
  0x28   : > { %1270 = vmatprep.subr.bf16.mxu0 %v1269_v32 }
  0x2a   : > { %1111 = vmatmul.mubr.msk.f32.vlgmr.msra.gmra.mrb[0].mxu0 %vm178_vm1, %v182_v35  ;;  %v1297_v35 = vpack.c.bf16 %v962_v34, %v961_v33  ;;  %v980_v33 = vld [vmem:[%s1721_s2 + $0x148] sm:$0xff] }
  0x2b   : > { %1272 = vmatpush3.bf16.msra.mxu0 %v1269_v32  ;;  %1129 = vmatprep.mubr.msk.f32.mxu0 %vm178_vm1, %v364_v37  ;;  %v1321_v32 = vpack.c.bf16 %v527_v31, %v526_v30  ;;  %v529_v37 = vld [vmem:[%s1721_s2 + $0x28] sm:$0xff]  ;;  %v978_v30 = vld [vmem:[%s1721_s2 + $0x138] sm:$0xff] }
  0x2c   : > { %1274 = vmatprep.subr.bf16.mxu0 %v1273_v36 }
  0x2d   : > { %1322 = vmatprep.subr.bf16.mxu1 %v1321_v32 }
  0x2e   : > { %1324 = vmatpush3.bf16.msra.mxu1 %v1321_v32  ;;  %v979_v32 = vld [vmem:[%s1721_s2 + $0x140] sm:$0xff] }
  0x2f   : > { %1276 = vmatpush3.bf16.msra.mxu0 %v1273_v36  ;;  %v528_v36 = vld [vmem:[%s1721_s2 + $0x20] sm:$0xff]  ;;  %v1365_v34 = vpack.c.bf16 %v980_v33, %v979_v32 }
  0x30   : > { %1278 = vmatprep.subr.bf16.mxu0 %v1277_v40  ;;  %v1325_v38 = vpack.c.bf16 %v529_v37, %v528_v36  ;;  %v982_v36 = vld [vmem:[%s1721_s2 + $0x158] sm:$0xff] }
  0x32   : > { %1326 = vmatprep.subr.bf16.mxu1 %v1325_v38 }
  0x33   : > { %1280 = vmatpush3.bf16.msra.mxu0 %v1277_v40  ;;  %v964_v40 = vld [vmem:[%s1721_s2 + $0xc8] sm:$0xff]  ;;  %1328 = vmatpush3.bf16.msra.mxu1 %v1325_v38  ;;  %v983_v38 = vld [vmem:[%s1721_s2 + $0x160] sm:$0xff] }
  0x34   : > { %1282 = vmatprep.subr.bf16.mxu0 %v1281_v43  ;;  %v1301_v41 = vpack.c.bf16 %v964_v40, %v963_v39  ;;  %v984_v39 = vld [vmem:[%s1721_s2 + $0x168] sm:$0xff] }
  0x35   : > { %v1373_v40 = vpack.c.bf16 %v984_v39, %v983_v38 }
  0x37   : > { %1284 = vmatpush3.bf16.msra.mxu0 %v1281_v43  ;;  %v531_v43 = vld [vmem:[%s1721_s2 + $0x38] sm:$0xff] }
  0x38   : > { %1286 = vmatprep.subr.bf16.mxu0 %v1285_v20 }
  0x3a   : > { %1130 = vmatmul.mubr.msk.f32.vlgmr.msra.gmra.mrb[0].mxu0 %vm178_vm1, %v365_v44 }
  0x3b   : > { %1288 = vmatpush3.bf16.msra.mxu0 %v1285_v20 }
  0x3c   : > { %1290 = vmatprep.subr.bf16.mxu0 %v1289_v23 }
  0x3f   : > { %1292 = vmatpush3.bf16.msra.mxu0 %v1289_v23 }
  0x40   : > { %1294 = vmatprep.subr.bf16.mxu0 %v1293_v29 }
  0x43   : > { %1296 = vmatpush3.bf16.msra.mxu0 %v1293_v29  ;;  %v977_v29 = vld [vmem:[%s1721_s2 + $0x130] sm:$0xff] }
  0x44   : > { %1298 = vmatprep.subr.bf16.mxu0 %v1297_v35  ;;  %v1361_v31 = vpack.c.bf16 %v978_v30, %v977_v29 }
  0x47   : > { %1300 = vmatpush3.bf16.msra.mxu0 %v1297_v35  ;;  %v981_v35 = vld [vmem:[%s1721_s2 + $0x150] sm:$0xff] }
  0x48   : > { %1302 = vmatprep.subr.bf16.mxu0 %v1301_v41  ;;  %v1369_v37 = vpack.c.bf16 %v982_v36, %v981_v35 }
  0x4b   : > { %1304 = vmatpush3.bf16.msra.mxu0 %v1301_v41  ;;  %v985_v41 = vld [vmem:[%s1721_s2 + $0x170] sm:$0xff] }
 0x10d   : > { %v1131_v45 = vpop.f32.mrb[0].mxu0 }
 0x10e   : > { %v447_v46 = vpop.f32.mrb[1].mxu0 }
 0x10f   : > { %v458_v47 = vadd.f32 %v1131_v45, %v447_v46 }
 0x111   : > { %v459_v48 = vrot.slane %v458_v47, 4 }
 0x113   : > { %v460_v49 = vadd.f32 %v459_v48, %v458_v47  ;;  %v966_v47 = vld [vmem:[%s1721_s2 + $0xd8] sm:$0xff] }
 0x115   : > { %v461_v50 = vrot.slane %v460_v49, 2 }
 0x117   : > { %v462_v51 = vadd.f32 %v461_v50, %v460_v49  ;;  %v532_v50 = vld [vmem:[%s1721_s2 + $0x40] sm:$0xff] }
 0x119   : > { %v463_v52 = vrot.slane %v462_v51, 1 }
 0x11b   : > { %v464_v53 = vadd.f32 %v463_v52, %v462_v51  ;;  %v533_v51 = vld [vmem:[%s1721_s2 + $0x48] sm:$0xff] }
 0x11c   : > { %v1333_v52 = vpack.c.bf16 %v533_v51, %v532_v50 }
 0x11d   : > { %465 = vrot.lane.b32.xlu0 %v464_v53, %s1415_s17 }
 0x18f   : > { %v466_v54 = vpop.permute.xlu0 %465 }
 0x190   : > { %v467_v55 = vadd.f32 %v466_v54, %v464_v53  ;;  %v967_v53 = vld [vmem:[%s1721_s2 + $0xe0] sm:$0xff]  ;;  %v968_v54 = vld [vmem:[%s1721_s2 + $0xe8] sm:$0xff] }
 0x192   : > { %468 = vrot.lane.b32.xlu0 %v467_v55, %s1416_s18 }
 0x204   : > { %v469_v56 = vpop.permute.xlu0 %468 }
 0x205   : > { %v470_v57 = vadd.f32 %v469_v56, %v467_v55  ;;  %v1309_v55 = vpack.c.bf16 %v968_v54, %v967_v53  ;;  %v534_v56 = vld [vmem:[%s1721_s2 + $0x50] sm:$0xff] }
 0x207   : > { %471 = vrot.lane.b32.xlu1 %v470_v57, %s1417_s19 }
 0x279   : > { %v472_v58 = vpop.permute.xlu1 %471 }
 0x27a   : > { %v473_v59 = vadd.f32 %v472_v58, %v470_v57  ;;  %v535_v57 = vld [vmem:[%s1721_s2 + $0x58] sm:$0xff] }
 0x27b   : > { %v1337_v58 = vpack.c.bf16 %v535_v57, %v534_v56 }
 0x27c   : > { %474 = vrot.lane.b32.xlu1 %v473_v59, %s1418_s20 }
 0x2ee   : > { %v475_v62 = vpop.permute.xlu1 %474 }
 0x2ef   : > { %v476_v0 = vadd.f32 %v475_v62, %v473_v59  ;;  %v969_v59 = vld [vmem:[%s1721_s2 + $0xf0] sm:$0xff]  ;;  %v536_v62 = vld [vmem:[%s1721_s2 + $0x60] sm:$0xff] }
 0x2f0   : > { %v1313_v61 = vpack.c.bf16 %v970_v60, %v969_v59 }
 0x2f1   : > { %v477_v1 = vmul.f32 0.00390625, %v476_v0  ;;  %v537_v0 = vld [vmem:[%s1721_s2 + $0x68] sm:$0xff] }
 0x2f3   : > { %v481_v2 = vrot.slane %v477_v1, %v1539_v63  ;;  %v1341_v1 = vpack.c.bf16 %v537_v0, %v536_v62 }
 0x2f5   : > { %v1542_v3 = vsub.f32 %v447_v46, %v481_v2  ;;  %v1544_v4 = vsub.f32 %v1131_v45, %v481_v2  ;;  %v1329_v45 = vpack.c.bf16 %v531_v43, %v530_v42  ;;  %v965_v46 = vld [vmem:[%s1721_s2 + $0xd0] sm:$0xff]  ;;  %v986_v42 = vld [vmem:[%s1721_s2 + $0x178] sm:$0xff] }
 0x2f6   : > { %v1305_v49 = vpack.c.bf16 %v966_v47, %v965_v46  ;;  %v538_v2 = vld [vmem:[%s1721_s2 + $0x70] sm:$0xff]  ;;  %v1377_v43 = vpack.c.bf16 %v986_v42, %v985_v41 }
 0x2f7   : > { %v484_v5 = vmul.f32 %v1542_v3, %v1542_v3  ;;  %v485_v6 = vmul.f32 %v1544_v4, %v1544_v4  ;;  %1330 = vmatprep.subr.bf16.mxu1 %v1329_v45 }
 0x2f8   : > { %1332 = vmatpush3.bf16.msra.mxu1 %v1329_v45  ;;  %1306 = vmatprep.subr.bf16.mxu0 %v1305_v49 }
 0x2f9   : > { %v486_v7 = vadd.f32 %v485_v6, %v484_v5  ;;  %1308 = vmatpush3.bf16.msra.mxu0 %v1305_v49  ;;  %1334 = vmatprep.subr.bf16.mxu1 %v1333_v52  ;;  %v539_v5 = vld [vmem:[%s1721_s2 + $0x78] sm:$0xff] }
 0x2fa   : > { %1310 = vmatprep.subr.bf16.mxu0 %v1309_v55  ;;  %v1345_v6 = vpack.c.bf16 %v539_v5, %v538_v2 }
 0x2fb   : > { %v487_v8 = vrot.slane %v486_v7, 4 }
 0x2fc   : > { %1336 = vmatpush3.bf16.msra.mxu1 %v1333_v52 }
 0x2fd   : > { %v488_v9 = vadd.f32 %v487_v8, %v486_v7  ;;  %1312 = vmatpush3.bf16.msra.mxu0 %v1309_v55  ;;  %1338 = vmatprep.subr.bf16.mxu1 %v1337_v58  ;;  %v971_v7 = vld [vmem:[%s1721_s2 + $0x100] sm:$0xff]  ;;  %v972_v8 = vld [vmem:[%s1721_s2 + $0x108] sm:$0xff] }
 0x2fe   : > { %1314 = vmatprep.subr.bf16.mxu0 %v1313_v61 }
 0x2ff   : > { %v489_v10 = vrot.slane %v488_v9, 2 }
 0x300   : > { %1340 = vmatpush3.bf16.msra.mxu1 %v1337_v58 }
 0x301   : > { %v490_v11 = vadd.f32 %v489_v10, %v488_v9  ;;  %1316 = vmatpush3.bf16.msra.mxu0 %v1313_v61  ;;  %1342 = vmatprep.subr.bf16.mxu1 %v1341_v1  ;;  %v1349_v9 = vpack.c.bf16 %v972_v8, %v971_v7 }
 0x303   : > { %v491_v12 = vrot.slane %v490_v11, 1 }
 0x304   : > { %1344 = vmatpush3.bf16.msra.mxu1 %v1341_v1 }
 0x305   : > { %v492_v13 = vadd.f32 %v491_v12, %v490_v11  ;;  %1346 = vmatprep.subr.bf16.mxu1 %v1345_v6 }
 0x307   : > { %493 = vrot.lane.b32.xlu0 %v492_v13, %s1415_s17 }
 0x308   : > { %1348 = vmatpush3.bf16.msra.mxu1 %v1345_v6 }
 0x309   : > { %1350 = vmatprep.subr.bf16.mxu1 %v1349_v9 }
 0x379   : > { %v494_v14 = vpop.permute.xlu0 %493 }
 0x37a   : > { %v495_v15 = vadd.f32 %v494_v14, %v492_v13 }
 0x37c   : > { %496 = vrot.lane.b32.xlu1 %v495_v15, %s1416_s18 }
 0x3ee   : > { %v497_v16 = vpop.permute.xlu1 %496 }
 0x3ef   : > { %v498_v17 = vadd.f32 %v497_v16, %v495_v15 }
 0x3f1   : > { %499 = vrot.lane.b32.xlu0 %v498_v17, %s1417_s19 }
 0x463   : > { %v500_v44 = vpop.permute.xlu0 %499 }
 0x464   : > { %v501_v48 = vadd.f32 %v500_v44, %v498_v17 }
 0x466   : > { %502 = vrot.lane.b32.xlu1 %v501_v48, %s1418_s20 }
 0x4d8   : > { %v503_v10 = vpop.permute.xlu1 %502 }
 0x4d9   : > { %v504_v11 = vadd.f32 %v503_v10, %v501_v48 }
 0x4db   : > { %v505_v12 = vmul.f32 0.00390625, %v504_v11 }
 0x4dd   : > { %v506_v13 = vadd.f32 1e-05, %v505_v12 }
 0x4df   : > { %1402 = vrsqrt.f32 %v506_v13 }
 0x4e9   : > { %v1403_v14 = vpop.eup %1402 }
 0x4ea   : > { %v511_v15 = vrot.slane %v1403_v14, %v1539_v63 }
 0x4ec   : > { %v512_v16 = vmul.f32 %v511_v15, %v1542_v3  ;;  %v513_v17 = vmul.f32 %v511_v15, %v1544_v4  ;;  %v974_v3 = vld [vmem:[%s1721_s2 + $0x118] sm:$0xff] }
 0x4ed   : > { %v1353_v24 = vpack.c.bf16 %v974_v3, %v973_v22 }
 0x4ee   : > { %vm514_vm2 = vcmp.ge.f32.partialorder %v512_v16, 0.0  ;;  %vm515_vm3 = vcmp.ge.f32.partialorder %v513_v17, 0.0  ;;  %v516_v18 = vmul.f32 0.2, %v512_v16  ;;  %v517_v19 = vmul.f32 0.2, %v513_v17 }
 0x4f0   : > { %v518_v20 = vsel %vm514_vm2, %v512_v16, %v516_v18  ;;  %v519_v21 = vsel %vm515_vm3, %v513_v17, %v517_v19 }
 0x4f1   : > { %520 = vst [vmem:[#allocation3 + $0x1] sm:$0xff] %v518_v20  ;;  %521 = vst [vmem:[#allocation3 + $0x9] sm:$0xff] %v519_v21  ;;  %1164 = vmatprep.mubr.f32.mxu0 %v518_v20 }
 0x4f2   : > { %1165 = vmatmul.mubr.f32.vlgmr.msra.gmra.mrb[2].mxu0 %v519_v21 }
 0x4f8   : > { %v522_v23 = vld [vmem:[#allocation3] sm:$0xff]  ;;  %v523_v4 = vld [vmem:[#allocation3 + $0x8] sm:$0xff] }
 0x4f9   : > { %1199 = vmatprep.mubr.f32.mxu1 %v522_v23  ;;  %v709_v27 = vld [vmem:[#allocation3 + $0x2] sm:$0xff]  ;;  %v710_v44 = vld [vmem:[#allocation3 + $0xa] sm:$0xff] }
 0x4fa   : > { %1200 = vmatmul.mubr.f32.vlgmr.msra.gmra.mrb[0].mxu1 %v523_v4 }
 0x4fb   : > { %1352 = vmatpush3.bf16.msra.mxu1 %v1349_v9  ;;  %1234 = vmatprep.mubr.f32.mxu1 %v709_v27 }
 0x4fc   : > { %1354 = vmatprep.subr.bf16.mxu1 %v1353_v24 }
 0x4ff   : > { %1356 = vmatpush3.bf16.msra.mxu1 %v1353_v24 }
 0x500   : > { %1358 = vmatprep.subr.bf16.mxu1 %v1357_v28 }
 0x503   : > { %1360 = vmatpush3.bf16.msra.mxu1 %v1357_v28 }
 0x504   : > { %1362 = vmatprep.subr.bf16.mxu1 %v1361_v31 }
 0x507   : > { %1364 = vmatpush3.bf16.msra.mxu1 %v1361_v31 }
 0x508   : > { %1366 = vmatprep.subr.bf16.mxu1 %v1365_v34 }
 0x50b   : > { %1368 = vmatpush3.bf16.msra.mxu1 %v1365_v34 }
 0x50c   : > { %1370 = vmatprep.subr.bf16.mxu1 %v1369_v37 }
 0x50f   : > { %1372 = vmatpush3.bf16.msra.mxu1 %v1369_v37 }
 0x510   : > { %1374 = vmatprep.subr.bf16.mxu1 %v1373_v40 }
 0x513   : > { %1376 = vmatpush3.bf16.msra.mxu1 %v1373_v40 }
 0x514   : > { %1378 = vmatprep.subr.bf16.mxu1 %v1377_v43 }
 0x517   : > { %1380 = vmatpush3.bf16.msra.mxu1 %v1377_v43 }
 0x51a   : > { %1235 = vmatmul.mubr.f32.vlgmr.msra.gmra.mrb[0].mxu1 %v710_v44 }
 0x5c5   : > { %v1166_v45 = vpop.f32.mrb[2].mxu0 }
 0x5c6   : > { %v625_v46 = vpop.f32.mrb[3].mxu0 }
 0x5ed   : > { %v1236_v47 = vpop.f32.mrb[0].mxu1 }
 0x5ee   : > { %v1381_v48 = vadd.f32 %v1236_v47, %v1166_v45  ;;  %v794_v49 = vpop.f32.mrb[1].mxu1 }
 0x5ef   : > { %v1382_v50 = vadd.f32 %v794_v49, %v625_v46 }
 0x5f1   : > { %v805_v51 = vadd.f32 %v1382_v50, %v1381_v48 }
 0x5f3   : > { %v806_v52 = vrot.slane %v805_v51, 4 }
 0x5f5   : > { %v807_v53 = vadd.f32 %v806_v52, %v805_v51 }
 0x5f7   : > { %v808_v54 = vrot.slane %v807_v53, 2 }
 0x5f9   : > { %v809_v55 = vadd.f32 %v808_v54, %v807_v53 }
 0x5fb   : > { %v810_v56 = vrot.slane %v809_v55, 1 }
 0x5fd   : > { %v811_v57 = vadd.f32 %v810_v56, %v809_v55 }
 0x5ff   : > { %812 = vrot.lane.b32.xlu0 %v811_v57, %s1415_s17 }
 0x671   : > { %v813_v58 = vpop.permute.xlu0 %812 }
 0x672   : > { %v814_v59 = vadd.f32 %v813_v58, %v811_v57 }
 0x674   : > { %815 = vrot.lane.b32.xlu1 %v814_v59, %s1416_s18 }
 0x6e6   : > { %v816_v60 = vpop.permute.xlu1 %815 }
 0x6e7   : > { %v817_v61 = vadd.f32 %v816_v60, %v814_v59 }
 0x6e9   : > { %818 = vrot.lane.b32.xlu0 %v817_v61, %s1417_s19 }
 0x75b   : > { %v819_v62 = vpop.permute.xlu0 %818 }
 0x75c   : > { %v820_v0 = vadd.f32 %v819_v62, %v817_v61 }
 0x75e   : > { %821 = vrot.lane.b32.xlu1 %v820_v0, %s1418_s20 }
 0x7d0   : > { %v822_v1 = vpop.permute.xlu1 %821 }
 0x7d1   : > { %v823_v2 = vadd.f32 %v822_v1, %v820_v0 }
 0x7d3   : > { %v824_v5 = vmul.f32 0.00390625, %v823_v2 }
 0x7d5   : > { %v828_v6 = vrot.slane %v824_v5, %v1539_v63 }
 0x7d7   : > { %v829_v7 = vsub.f32 %v1382_v50, %v828_v6  ;;  %v830_v8 = vsub.f32 %v1381_v48, %v828_v6 }
 0x7d9   : > { %v831_v9 = vmul.f32 %v829_v7, %v829_v7  ;;  %v832_v10 = vmul.f32 %v830_v8, %v830_v8 }
 0x7db   : > { %v833_v11 = vadd.f32 %v832_v10, %v831_v9 }
 0x7dd   : > { %v834_v12 = vrot.slane %v833_v11, 4 }
 0x7df   : > { %v835_v13 = vadd.f32 %v834_v12, %v833_v11 }
 0x7e1   : > { %v836_v14 = vrot.slane %v835_v13, 2 }
 0x7e3   : > { %v837_v15 = vadd.f32 %v836_v14, %v835_v13 }
 0x7e5   : > { %v838_v16 = vrot.slane %v837_v15, 1 }
 0x7e7   : > { %v839_v17 = vadd.f32 %v838_v16, %v837_v15 }
 0x7e9   : > { %840 = vrot.lane.b32.xlu0 %v839_v17, %s1415_s17 }
 0x85b   : > { %v841_v18 = vpop.permute.xlu0 %840 }
 0x85c   : > { %v842_v19 = vadd.f32 %v841_v18, %v839_v17 }
 0x85e   : > { %843 = vrot.lane.b32.xlu1 %v842_v19, %s1416_s18 }
 0x8d0   : > { %v844_v20 = vpop.permute.xlu1 %843 }
 0x8d1   : > { %v845_v21 = vadd.f32 %v844_v20, %v842_v19 }
 0x8d3   : > { %846 = vrot.lane.b32.xlu0 %v845_v21, %s1417_s19 }
 0x945   : > { %v847_v22 = vpop.permute.xlu0 %846 }
 0x946   : > { %v848_v3 = vadd.f32 %v847_v22, %v845_v21 }
 0x948   : > { %849 = vrot.lane.b32.xlu1 %v848_v3, %s1418_s20 }
 0x9ba   : > { %v850_v23 = vpop.permute.xlu1 %849 }
 0x9bb   : > { %v851_v4 = vadd.f32 %v850_v23, %v848_v3 }
 0x9bd   : > { %v852_v24 = vmul.f32 0.00390625, %v851_v4 }
 0x9bf   : > { %v853_v25 = vadd.f32 1e-05, %v852_v24 }
 0x9c1   : > { %1404 = vrsqrt.f32 %v853_v25 }
 0x9cb   : > { %v1405_v26 = vpop.eup %1404 }
 0x9cc   : > { %v858_v27 = vrot.slane %v1405_v26, %v1539_v63 }
 0x9ce   : > { %v859_v28 = vmul.f32 %v858_v27, %v829_v7  ;;  %v860_v29 = vmul.f32 %v858_v27, %v830_v8 }
 0x9d0   : > { %vm861_vm4 = vcmp.ge.f32.partialorder %v859_v28, 0.0  ;;  %vm862_vm5 = vcmp.ge.f32.partialorder %v860_v29, 0.0  ;;  %v863_v30 = vmul.f32 0.2, %v859_v28  ;;  %v864_v31 = vmul.f32 0.2, %v860_v29 }
 0x9d2   : > { %v865_v32 = vsel %vm861_vm4, %v859_v28, %v863_v30  ;;  %v866_v33 = vsel %vm862_vm5, %v860_v29, %v864_v31 }
 0x9d3   : > { %867 = vst [vmem:[%s170_s11] sm:$0xff] %v865_v32  ;;  %868 = vst [vmem:[%s170_s11 + $0x8] sm:$0xff] %v866_v33 }
 0x9d4 PF: > { %s13_s12 = sadd.s32 1, %s1412_s12  }
 0x9d5   : > { %p10_p4 = scmp.ge.s32.totalorder %s13_s12, 4  }
 0x9d7   :  { %12 = sbr.rel (!%p10_p4) target bundleno = 1 (0x1), region = 66 }

</bundles_post_ra>
